<compile_context>
chip_gen: v7x
topology: tpu7x:2x2x1
jax: 0.10.0
libtpu: 0.0.40
codegen_flags: <defaults>
</compile_context>

<pallas_src>
import numpy as np
import jax
import jax.numpy as jnp
from jax import lax
from jax.experimental import pallas as pl
from jax.experimental.pallas import tpu as pltpu

_LANE = 128
_SUBLANE = 8
_VMEM_REQUEST = 48 * 1024 * 1024   # scoped-VMEM request: > 16/32 MiB defaults, < v7x 64 MiB physical
_VMEM_FILL = 0.8                   # fraction of the request we plan blocks into (headroom for internals)


# --------------------------------------------------------------------------- #
# VMEM-budget-aware tile selection
# --------------------------------------------------------------------------- #

def _round_up(x, k):
    return -(-x // k) * k


def _tile_vmem_bytes(rows, cols, itemsize):
    """VMEM footprint of one (rows, cols) block after (sublane, lane) padding."""
    sublane = _SUBLANE * (4 // itemsize)      # f32/i32 -> 8 rows, int8 -> 32 (packed)
    return _round_up(max(rows, 1), sublane) * _round_up(max(cols, 1), _LANE) * itemsize


def _divisor_tiles(total, multiple):
    """Divisors of `total` that are multiples of `multiple`, descending."""
    return [d for d in range(total, 0, -1) if total % d == 0 and d % multiple == 0]


def _mask_dtype_for(tb):
    # int8 packs 4 rows per 32-bit sublane; use it only when the batch tile is a
    # multiple of 32 so the mask writeback avoids packed partial stores.
    return (jnp.int8, 1) if tb % 32 == 0 else (jnp.int32, 4)


def _batch_tile_candidates(B):
    """Batch tiles (divisors of B, multiples of 8) capped so B>=16 gives >=2
    grid blocks (megacore sharding on v7x), descending."""
    if B % _SUBLANE != 0:
        # TODO(synk): pad B up to a multiple of 8 in the wrapper for large odd batches.
        return [B]
    if B >= 64:
        cap = B // 4
    elif B >= 16:
        cap = B // 2
    else:
        cap = B
    cands = [d for d in _divisor_tiles(B, _SUBLANE) if d <= cap]
    return cands or [B]


def _resident_block_bytes(tb, m, n, mask_isz):
    """Double-buffered streamed blocks for one grid step of the resident-A path."""
    per = (_tile_vmem_bytes(tb, m, 4)                 # res
           + _tile_vmem_bytes(tb, n, 1)               # WSup (int8)
           + _tile_vmem_bytes(tb, n, 4)               # weight
           + _tile_vmem_bytes(tb, n, mask_isz)        # Mask out
           + _tile_vmem_bytes(tb, m, 4))              # y_pred out
    return 2 * per


def _pick_tb_resident(B, m, n):
    """Largest batch tile that fits the VMEM budget with A resident; None if
    even the smallest tile (or A itself) does not fit -> use the n-tiled path."""
    budget = int(_VMEM_FILL * _VMEM_REQUEST)
    avail = budget - _tile_vmem_bytes(m, n, 4)        # A: single-buffered, resident
    if avail <= 0:
        return None
    for tb in _batch_tile_candidates(B):
        _, mask_isz = _mask_dtype_for(tb)
        if _resident_block_bytes(tb, m, n, mask_isz) <= avail:
            return tb
    return None


def _ntiled_block_bytes(tb, tn, m, mask_isz):
    per = (_tile_vmem_bytes(tb, m, 4)                 # res
           + _tile_vmem_bytes(tb, 1, 4)               # row max
           + _tile_vmem_bytes(tb, tn, 1)              # WSup (int8)
           + _tile_vmem_bytes(tb, tn, 4)              # weight
           + _tile_vmem_bytes(tb, tn, mask_isz)       # Mask out
           + _tile_vmem_bytes(tb, m, 4))              # y_pred out
    return 2 * per


def _pick_tiles_ntiled(B, m, n):
    """(tb, tn) for the two-pass n-tiled path, VMEM-budget-aware (best effort)."""
    budget = int(_VMEM_FILL * _VMEM_REQUEST)
    # TODO(synk): pad n to a multiple of 128 in the wrapper when n has no such divisor.
    tn_cands = _divisor_tiles(n, _LANE) or [n]
    tn = tn_cands[-1]
    for cand in tn_cands:                             # descending -> largest that fits
        if 2 * _tile_vmem_bytes(m, cand, 4) <= budget // 2:
            tn = cand
            break
    avail = budget - 2 * _tile_vmem_bytes(m, tn, 4)
    tb_cands = _batch_tile_candidates(B)
    tb = tb_cands[-1]
    for cand in tb_cands:
        _, mask_isz = _mask_dtype_for(cand)
        if _ntiled_block_bytes(cand, tn, m, mask_isz) <= avail:
            tb = cand
            break
    return tb, tn


# --------------------------------------------------------------------------- #
# Kernels
# --------------------------------------------------------------------------- #

def _csrec2_resident_kernel(th_ref, res_ref, a_ref, wsup_ref, weight_ref,
                            mask_ref, ypred_ref):
    a = a_ref[...]                                    # (m, n), VMEM-resident
    th = th_ref[0]
    # corr = |res @ A|   (MXU, f32 accumulation)
    corr = jnp.abs(jnp.dot(res_ref[...], a, preferred_element_type=jnp.float32))
    # corr/rowmax > Th  <=>  corr > Th*rowmax  (no divide; an all-zero row gives
    # False, matching torch's NaN > Th == False).  Boundary elements within ~1
    # ULP of the threshold can differ from the divide-then-compare form.
    corr_max = jnp.max(corr, axis=1, keepdims=True)
    mask = jnp.logical_or(corr > th * corr_max, wsup_ref[...] != 0)
    s = weight_ref[...] * mask.astype(jnp.float32)
    # y_pred = s @ A.T: contract the n axis of both operands so no transposed
    # copy of A is materialized in VMEM.
    # TODO(synk): confirm via pl.lower_as_mlir that this folds into the MXU
    # weight push (no vxpose of A); otherwise pass a pre-transposed A_T.
    ypred = lax.dot_general(s, a, (((1,), (1,)), ((), ())),
                            preferred_element_type=jnp.float32)
    mask_ref[...] = mask.astype(mask_ref.dtype)
    ypred_ref[...] = ypred.astype(ypred_ref.dtype)


def _rowmax_kernel(res_ref, a_ref, rmax_ref):
    """Pass 1 of the n-tiled path: per-row max of |res @ A| over n tiles."""
    k = pl.program_id(1)
    corr = jnp.abs(jnp.dot(res_ref[...], a_ref[...],
                           preferred_element_type=jnp.float32))
    tile_max = jnp.max(corr, axis=1, keepdims=True)

    @pl.when(k == 0)
    def _():
        rmax_ref[...] = tile_max

    @pl.when(k > 0)
    def _():
        rmax_ref[...] = jnp.maximum(rmax_ref[...], tile_max)


def _masked_proj_kernel(th_ref, res_ref, a_ref, rmax_ref, wsup_ref, weight_ref,
                        mask_ref, ypred_ref):
    """Pass 2 of the n-tiled path: Mask tile + y_pred accumulation over n tiles."""
    k = pl.program_id(1)
    a = a_ref[...]                                    # (m, tn)
    corr = jnp.abs(jnp.dot(res_ref[...], a, preferred_element_type=jnp.float32))
    mask = jnp.logical_or(corr > th_ref[0] * rmax_ref[...], wsup_ref[...] != 0)
    s = weight_ref[...] * mask.astype(jnp.float32)
    part = lax.dot_general(s, a, (((1,), (1,)), ((), ())),
                           preferred_element_type=jnp.float32)
    mask_ref[...] = mask.astype(mask_ref.dtype)

    # y_pred block index is constant along k -> output-resident accumulator.
    @pl.when(k == 0)
    def _():
        ypred_ref[...] = part

    @pl.when(k > 0)
    def _():
        ypred_ref[...] += part


# --------------------------------------------------------------------------- #
# pallas_call wrappers
# --------------------------------------------------------------------------- #

def _forward_resident(th_arr, res, A, wsup_i8, weight, tb):
    B, m = res.shape
    n = A.shape[1]
    mask_dtype, mask_isz = _mask_dtype_for(tb)
    grid = (B // tb,)
    cost = pl.CostEstimate(
        flops=int(4 * B * m * n),
        bytes_accessed=int(4 * B * m + 4 * m * n + B * n + 4 * B * n
                           + mask_isz * B * n + 4 * B * m),
        transcendentals=0)
    params = pltpu.CompilerParams(
        dimension_semantics=("parallel",),            # batch blocks are independent
        vmem_limit_bytes=_VMEM_REQUEST)

    def build(single_buffer_a):
        a_kwargs = {"pipeline_mode": pl.Buffered(1)} if single_buffer_a else {}
        return pl.pallas_call(
            _csrec2_resident_kernel,
            grid=grid,
            in_specs=[
                pl.BlockSpec(memory_space=pltpu.MemorySpace.SMEM),        # Th (scalar)
                pl.BlockSpec((tb, m), lambda i: (i, 0)),                  # res
                pl.BlockSpec((m, n), lambda i: (0, 0), **a_kwargs),       # A (resident)
                pl.BlockSpec((tb, n), lambda i: (i, 0)),                  # WSup (int8)
                pl.BlockSpec((tb, n), lambda i: (i, 0)),                  # weight
            ],
            out_specs=(
                pl.BlockSpec((tb, n), lambda i: (i, 0)),                  # Mask
                pl.BlockSpec((tb, m), lambda i: (i, 0)),                  # y_pred
            ),
            out_shape=(
                jax.ShapeDtypeStruct((B, n), mask_dtype),
                jax.ShapeDtypeStruct((B, m), jnp.float32),
            ),
            compiler_params=params,
            cost_estimate=cost,
        )

    try:
        return build(True)(th_arr, res, A, wsup_i8, weight)
    except Exception:
        # Some jax versions reject buffer_count=1; the default (double-buffered)
        # spec still only DMAs A once because its block index never changes.
        return build(False)(th_arr, res, A, wsup_i8, weight)


def _forward_ntiled(th_arr, res, A, wsup_i8, weight, tb, tn):
    B, m = res.shape
    n = A.shape[1]
    mask_dtype, mask_isz = _mask_dtype_for(tb)
    grid = (B // tb, n // tn)
    params = pltpu.CompilerParams(
        dimension_semantics=("parallel", "arbitrary"),
        vmem_limit_bytes=_VMEM_REQUEST)

    # Pass 1: per-row max of |res @ A| (threshold reference for normalization).
    rmax = pl.pallas_call(
        _rowmax_kernel,
        grid=grid,
        in_specs=[
            pl.BlockSpec((tb, m), lambda i, k: (i, 0)),                   # res
            pl.BlockSpec((m, tn), lambda i, k: (0, k)),                   # A tile
        ],
        out_specs=pl.BlockSpec((tb, 1), lambda i, k: (i, 0)),             # row max
        out_shape=jax.ShapeDtypeStruct((B, 1), jnp.float32),
        compiler_params=params,
        cost_estimate=pl.CostEstimate(
            flops=int(2 * B * m * n),
            bytes_accessed=int(4 * B * m + 4 * m * n + 4 * B),
            transcendentals=0),
    )(res, A)

    # Pass 2: Mask tiles + y_pred via an output-resident accumulator over n tiles.
    mask_raw, ypred = pl.pallas_call(
        _masked_proj_kernel,
        grid=grid,
        in_specs=[
            pl.BlockSpec(memory_space=pltpu.MemorySpace.SMEM),            # Th (scalar)
            pl.BlockSpec((tb, m), lambda i, k: (i, 0)),                   # res
            pl.BlockSpec((m, tn), lambda i, k: (0, k)),                   # A tile
            pl.BlockSpec((tb, 1), lambda i, k: (i, 0)),                   # row max
            pl.BlockSpec((tb, tn), lambda i, k: (i, k)),                  # WSup (int8)
            pl.BlockSpec((tb, tn), lambda i, k: (i, k)),                  # weight
        ],
        out_specs=(
            pl.BlockSpec((tb, tn), lambda i, k: (i, k)),                  # Mask
            pl.BlockSpec((tb, m), lambda i, k: (i, 0)),                   # y_pred (resident)
        ),
        out_shape=(
            jax.ShapeDtypeStruct((B, n), mask_dtype),
            jax.ShapeDtypeStruct((B, m), jnp.float32),
        ),
        compiler_params=params,
        cost_estimate=pl.CostEstimate(
            flops=int(4 * B * m * n),
            bytes_accessed=int(4 * B * m + 4 * m * n + B * n + 4 * B * n
                               + mask_isz * B * n + 4 * B * m),
            transcendentals=0),
    )(th_arr, res, A, rmax, wsup_i8, weight)
    return mask_raw, ypred


def csrec2_forward(res, A, WSup, weight, Th=0.85, *, force_n_tiled=False,
                   _force_tiles=None):
    """res: (B, m) f32, A: (m, n) f32 (column-normalized), WSup/weight: (B, n) f32.
    Returns (Mask bool (B, n), y_pred f32 (B, m), weight)."""
    res = jnp.asarray(res, jnp.float32)
    A = jnp.asarray(A, jnp.float32)
    weight = jnp.asarray(weight, jnp.float32)
    B, m = res.shape
    n = A.shape[1]

    # torch's WSup.bool() == nonzero; stream it as int8 (4x fewer HBM bytes).
    wsup_i8 = (jnp.asarray(WSup) != 0).astype(jnp.int8)
    # Th lives in SMEM -> sweeping Th does not trigger a recompile.
    th_arr = jnp.full((1,), Th, dtype=jnp.float32)

    tb = None if force_n_tiled else _pick_tb_resident(B, m, n)
    if tb is not None:
        mask_raw, ypred = _forward_resident(th_arr, res, A, wsup_i8, weight, tb)
    else:
        tb2, tn = _force_tiles if _force_tiles is not None else _pick_tiles_ntiled(B, m, n)
        mask_raw, ypred = _forward_ntiled(th_arr, res, A, wsup_i8, weight, tb2, tn)

    return mask_raw.astype(jnp.bool_), ypred, weight


# --------------------------------------------------------------------------- #
# Reference + demo
# --------------------------------------------------------------------------- #

def _reference(res, A, WSup, weight, Th=0.85):
    corr = jnp.abs(res @ A)
    corr = corr / jnp.max(corr, axis=1, keepdims=True)
    Mask = jnp.logical_or(corr > Th, WSup != 0.0)
    s = weight * Mask.astype(jnp.float32)
    y_pred = (A @ s.T).T
    return Mask, y_pred, weight


if __name__ == "__main__":
    # Small shapes consistent with the module: n sensing columns, m = int(0.15*n)
    # measurements, batch B (the module's W parameter row count matches B so the
    # elementwise `weight * Mask` broadcast is valid, as the forward implies).
    n = 256
    r = 0.15
    m = int(np.int32(n * r))   # 38
    B = 16                     # batch == rows of the learned weight

    key = jax.random.PRNGKey(0)
    k_a, k_res, k_wsup, k_keep, k_w = jax.random.split(key, 5)

    # A, column-normalized as in the driver script: A = A / ||A_col||
    A = jax.random.normal(k_a, (m, n), dtype=jnp.float32)
    A = A * (1.0 / jnp.linalg.norm(A, axis=0, keepdims=True))

    res = jax.random.normal(k_res, (B, m), dtype=jnp.float32)

    # Sparse support so both Mask branches (threshold and WSup) are exercised.
    wsup_vals = jax.random.normal(k_wsup, (B, n), dtype=jnp.float32)
    wsup_keep = jax.random.uniform(k_keep, (B, n)) < 0.3
    WSup = jnp.where(wsup_keep, wsup_vals, 0.0)

    # xavier_uniform_ for a (B, n) weight: bound = sqrt(6 / (fan_in + fan_out))
    bound = float(np.sqrt(6.0 / (B + n)))
    weight = jax.random.uniform(k_w, (B, n), dtype=jnp.float32,
                                minval=-bound, maxval=bound)

    Mask_ref, y_ref, _ = _reference(res, A, WSup, weight, Th=0.85)

    # Main path: A VMEM-resident, batch-tiled parallel grid.
    Mask, y_pred, w_out = csrec2_forward(res, A, WSup, weight, Th=0.85)
    jax.block_until_ready((Mask, y_pred, w_out))
    assert bool(jnp.all(Mask == Mask_ref))
    np.testing.assert_allclose(np.asarray(y_pred), np.asarray(y_ref),
                               rtol=1e-5, atol=1e-5)

    # Large-A fallback: force the n-tiled two-pass path at small shapes so the
    # accumulator / two-pass row-max logic is exercised and verified.
    Mask2, y2, _ = csrec2_forward(res, A, WSup, weight, Th=0.85,
                                  force_n_tiled=True, _force_tiles=(8, 128))
    jax.block_until_ready((Mask2, y2))
    assert bool(jnp.all(Mask2 == Mask_ref))
    np.testing.assert_allclose(np.asarray(y2), np.asarray(y_ref),
                               rtol=1e-5, atol=1e-5)

    print("KERNEL_OK")
</pallas_src>

<mosaic_0001>
module attributes {stable_mosaic.version = 11 : i64} {
  func.func @_csrec2_resident_kernel(%arg0: i32, %arg1: memref<1xf32, #tpu.memory_space<smem>>, %arg2: memref<8x38xf32, #tpu.memory_space<vmem>>, %arg3: memref<38x256xf32, #tpu.memory_space<vmem>>, %arg4: memref<8x256xi8, #tpu.memory_space<vmem>>, %arg5: memref<8x256xf32, #tpu.memory_space<vmem>>, %arg6: memref<8x256xi32, #tpu.memory_space<vmem>>, %arg7: memref<8x38xf32, #tpu.memory_space<vmem>>) attributes {dimension_semantics = [#tpu.dimension_semantics<parallel>], iteration_bounds = array<i64: 2>, scalar_prefetch = 0 : i64, scratch_operands = 0 : i64, tpu.core_type = #tpu.core_type<tc>, window_params = [{transform_indices = @transform_0, window_bounds = array<i64: 1>}, {transform_indices = @transform_1, window_bounds = array<i64: 8, 38>}, {pipeline_mode = #tpu.pipeline_mode<synchronous>, transform_indices = @transform_2, window_bounds = array<i64: 38, 256>}, {transform_indices = @transform_3, window_bounds = array<i64: 8, 256>}, {transform_indices = @transform_4, window_bounds = array<i64: 8, 256>}, {transform_indices = @transform_5, window_bounds = array<i64: 8, 256>}, {transform_indices = @transform_6, window_bounds = array<i64: 8, 38>}]} {
    %c0 = arith.constant 0 : index
    %c0_0 = arith.constant 0 : index
    %0 = vector.load %arg3[%c0, %c0_0] : memref<38x256xf32, #tpu.memory_space<vmem>>, vector<38x256xf32>
    %c0_1 = arith.constant 0 : index
    %1 = memref.load %arg1[%c0_1] : memref<1xf32, #tpu.memory_space<smem>>
    %c0_2 = arith.constant 0 : index
    %c0_3 = arith.constant 0 : index
    %2 = vector.load %arg2[%c0_2, %c0_3] : memref<8x38xf32, #tpu.memory_space<vmem>>, vector<8x38xf32>
    %cst = arith.constant dense<0.000000e+00> : vector<8x256xf32>
    %3 = tpu.matmul %2, %0, %cst {dimension_numbers = #tpu.dot_dimension_numbers<[1], [0], [0], [1], [0, 0, 1, 1], [], []>} : vector<8x38xf32>, vector<38x256xf32>, vector<8x256xf32> -> vector<8x256xf32>
    %4 = math.absf %3 : vector<8x256xf32>
    %cst_4 = arith.constant dense<0xFF800000> : vector<8xf32>
    %5 = vector.multi_reduction <maximumf>, %4, %cst_4 [1] : vector<8x256xf32> to vector<8xf32>
    %6 = vector.shape_cast %5 : vector<8xf32> to vector<8x1xf32>
    %7 = vector.broadcast %1 : f32 to vector<8x1xf32>
    %8 = arith.mulf %7, %6 : vector<8x1xf32>
    %9 = vector.broadcast %8 : vector<8x1xf32> to vector<8x256xf32>
    %10 = arith.cmpf ogt, %4, %9 : vector<8x256xf32>
    %c0_5 = arith.constant 0 : index
    %c0_6 = arith.constant 0 : index
    %11 = vector.load %arg4[%c0_5, %c0_6] : memref<8x256xi8, #tpu.memory_space<vmem>>, vector<8x256xi8>
    %c0_i8 = arith.constant 0 : i8
    %12 = vector.broadcast %c0_i8 : i8 to vector<8x256xi8>
    %13 = arith.cmpi ne, %11, %12 : vector<8x256xi8>
    %14 = arith.ori %10, %13 : vector<8x256xi1>
    %c0_7 = arith.constant 0 : index
    %c0_8 = arith.constant 0 : index
    %15 = vector.load %arg5[%c0_7, %c0_8] : memref<8x256xf32, #tpu.memory_space<vmem>>, vector<8x256xf32>
    %16 = arith.extui %14 : vector<8x256xi1> to vector<8x256xi32>
    %17 = arith.sitofp %16 : vector<8x256xi32> to vector<8x256xf32>
    %18 = arith.mulf %15, %17 : vector<8x256xf32>
    %cst_9 = arith.constant dense<0.000000e+00> : vector<8x38xf32>
    %19 = tpu.matmul %18, %0, %cst_9 {dimension_numbers = #tpu.dot_dimension_numbers<[1], [1], [0], [0], [0, 0, 1, 0], [], []>} : vector<8x256xf32>, vector<38x256xf32>, vector<8x38xf32> -> vector<8x38xf32>
    %20 = arith.extui %14 : vector<8x256xi1> to vector<8x256xi32>
    %c0_10 = arith.constant 0 : index
    %c0_11 = arith.constant 0 : index
    %21 = vector.load %arg6[%c0_10, %c0_11] : memref<8x256xi32, #tpu.memory_space<vmem>>, vector<8x256xi32>
    tpu.vector_store %arg6[%c0_10, %c0_11], %20 {strides = array<i32>} : memref<8x256xi32, #tpu.memory_space<vmem>>, vector<8x256xi32>,
    %c0_12 = arith.constant 0 : index
    %c0_13 = arith.constant 0 : index
    %22 = vector.load %arg7[%c0_12, %c0_13] : memref<8x38xf32, #tpu.memory_space<vmem>>, vector<8x38xf32>
    tpu.vector_store %arg7[%c0_12, %c0_13], %19 {strides = array<i32>} : memref<8x38xf32, #tpu.memory_space<vmem>>, vector<8x38xf32>,
    return
  }
  func.func @transform_0(%arg0: i32) -> i32 {
    %c0_i32 = arith.constant 0 : i32
    %c0_i32_0 = arith.constant 0 : i32
    return %c0_i32 : i32
  }
  func.func @transform_1(%arg0: i32) -> (i32, i32) {
    %c0_i32 = arith.constant 0 : i32
    %c0_i32_0 = arith.constant 0 : i32
    return %arg0, %c0_i32 : i32, i32
  }
  func.func @transform_2(%arg0: i32) -> (i32, i32) {
    %c0_i32 = arith.constant 0 : i32
    %c0_i32_0 = arith.constant 0 : i32
    %c0_i32_1 = arith.constant 0 : i32
    return %c0_i32, %c0_i32_0 : i32, i32
  }
  func.func @transform_3(%arg0: i32) -> (i32, i32) {
    %c0_i32 = arith.constant 0 : i32
    %c0_i32_0 = arith.constant 0 : i32
    return %arg0, %c0_i32 : i32, i32
  }
  func.func @transform_4(%arg0: i32) -> (i32, i32) {
    %c0_i32 = arith.constant 0 : i32
    %c0_i32_0 = arith.constant 0 : i32
    return %arg0, %c0_i32 : i32, i32
  }
  func.func @transform_5(%arg0: i32) -> (i32, i32) {
    %c0_i32 = arith.constant 0 : i32
    %c0_i32_0 = arith.constant 0 : i32
    return %arg0, %c0_i32 : i32, i32
  }
  func.func @transform_6(%arg0: i32) -> (i32, i32) {
    %c0_i32 = arith.constant 0 : i32
    %c0_i32_0 = arith.constant 0 : i32
    return %arg0, %c0_i32 : i32, i32
  }
}

module attributes {stable_mosaic.version = 11 : i64} {
  func.func @_csrec2_resident_kernel(%arg0: i32, %arg1: memref<1xf32, #tpu.memory_space<smem>>, %arg2: memref<8x38xf32, #tpu.memory_space<vmem>>, %arg3: memref<38x256xf32, #tpu.memory_space<vmem>>, %arg4: memref<8x256xi8, #tpu.memory_space<vmem>>, %arg5: memref<8x256xf32, #tpu.memory_space<vmem>>, %arg6: memref<8x256xi32, #tpu.memory_space<vmem>>, %arg7: memref<8x38xf32, #tpu.memory_space<vmem>>) attributes {dimension_semantics = [#tpu.dimension_semantics<parallel>], iteration_bounds = array<i64: 2>, scalar_prefetch = 0 : i64, scratch_operands = 0 : i64, tpu.core_type = #tpu.core_type<tc>, window_params = [{transform_indices = @transform_0, window_bounds = array<i64: 1>}, {transform_indices = @transform_1, window_bounds = array<i64: 8, 38>}, {pipeline_mode = #tpu.pipeline_mode<synchronous>, transform_indices = @transform_2, window_bounds = array<i64: 38, 256>}, {transform_indices = @transform_3, window_bounds = array<i64: 8, 256>}, {transform_indices = @transform_4, window_bounds = array<i64: 8, 256>}, {transform_indices = @transform_5, window_bounds = array<i64: 8, 256>}, {transform_indices = @transform_6, window_bounds = array<i64: 8, 38>}]} {
    %c0 = arith.constant 0 : index
    %c0_0 = arith.constant 0 : index
    %0 = vector.load %arg3[%c0, %c0_0] : memref<38x256xf32, #tpu.memory_space<vmem>>, vector<38x256xf32>
    %c0_1 = arith.constant 0 : index
    %1 = memref.load %arg1[%c0_1] : memref<1xf32, #tpu.memory_space<smem>>
    %c0_2 = arith.constant 0 : index
    %c0_3 = arith.constant 0 : index
    %2 = vector.load %arg2[%c0_2, %c0_3] : memref<8x38xf32, #tpu.memory_space<vmem>>, vector<8x38xf32>
    %cst = arith.constant dense<0.000000e+00> : vector<8x256xf32>
    %3 = tpu.matmul %2, %0, %cst {dimension_numbers = #tpu.dot_dimension_numbers<[1], [0], [0], [1], [0, 0, 1, 1], [], []>} : vector<8x38xf32>, vector<38x256xf32>, vector<8x256xf32> -> vector<8x256xf32>
    %4 = math.absf %3 : vector<8x256xf32>
    %cst_4 = arith.constant dense<0xFF800000> : vector<8xf32>
    %5 = vector.multi_reduction <maximumf>, %4, %cst_4 [1] : vector<8x256xf32> to vector<8xf32>
    %6 = vector.shape_cast %5 : vector<8xf32> to vector<8x1xf32>
    %7 = vector.broadcast %1 : f32 to vector<8x1xf32>
    %8 = arith.mulf %7, %6 : vector<8x1xf32>
    %9 = vector.broadcast %8 : vector<8x1xf32> to vector<8x256xf32>
    %10 = arith.cmpf ogt, %4, %9 : vector<8x256xf32>
    %c0_5 = arith.constant 0 : index
    %c0_6 = arith.constant 0 : index
    %11 = vector.load %arg4[%c0_5, %c0_6] : memref<8x256xi8, #tpu.memory_space<vmem>>, vector<8x256xi8>
    %c0_i8 = arith.constant 0 : i8
    %12 = vector.broadcast %c0_i8 : i8 to vector<8x256xi8>
    %13 = arith.cmpi ne, %11, %12 : vector<8x256xi8>
    %14 = arith.ori %10, %13 : vector<8x256xi1>
    %c0_7 = arith.constant 0 : index
    %c0_8 = arith.constant 0 : index
    %15 = vector.load %arg5[%c0_7, %c0_8] : memref<8x256xf32, #tpu.memory_space<vmem>>, vector<8x256xf32>
    %16 = arith.extui %14 : vector<8x256xi1> to vector<8x256xi32>
    %17 = arith.sitofp %16 : vector<8x256xi32> to vector<8x256xf32>
    %18 = arith.mulf %15, %17 : vector<8x256xf32>
    %cst_9 = arith.constant dense<0.000000e+00> : vector<8x38xf32>
    %19 = tpu.matmul %18, %0, %cst_9 {dimension_numbers = #tpu.dot_dimension_numbers<[1], [1], [0], [0], [0, 0, 1, 0], [], []>} : vector<8x256xf32>, vector<38x256xf32>, vector<8x38xf32> -> vector<8x38xf32>
    %20 = arith.extui %14 : vector<8x256xi1> to vector<8x256xi32>
    %c0_10 = arith.constant 0 : index
    %c0_11 = arith.constant 0 : index
    %21 = vector.load %arg6[%c0_10, %c0_11] : memref<8x256xi32, #tpu.memory_space<vmem>>, vector<8x256xi32>
    tpu.vector_store %arg6[%c0_10, %c0_11], %20 {strides = array<i32>} : memref<8x256xi32, #tpu.memory_space<vmem>>, vector<8x256xi32>,
    %c0_12 = arith.constant 0 : index
    %c0_13 = arith.constant 0 : index
    %22 = vector.load %arg7[%c0_12, %c0_13] : memref<8x38xf32, #tpu.memory_space<vmem>>, vector<8x38xf32>
    tpu.vector_store %arg7[%c0_12, %c0_13], %19 {strides = array<i32>} : memref<8x38xf32, #tpu.memory_space<vmem>>, vector<8x38xf32>,
    return
  }
  func.func @transform_0(%arg0: i32) -> i32 {
    %c0_i32 = arith.constant 0 : i32
    %c0_i32_0 = arith.constant 0 : i32
    return %c0_i32 : i32
  }
  func.func @transform_1(%arg0: i32) -> (i32, i32) {
    %c0_i32 = arith.constant 0 : i32
    %c0_i32_0 = arith.constant 0 : i32
    return %arg0, %c0_i32 : i32, i32
  }
  func.func @transform_2(%arg0: i32) -> (i32, i32) {
    %c0_i32 = arith.constant 0 : i32
    %c0_i32_0 = arith.constant 0 : i32
    %c0_i32_1 = arith.constant 0 : i32
    return %c0_i32, %c0_i32_0 : i32, i32
  }
  func.func @transform_3(%arg0: i32) -> (i32, i32) {
    %c0_i32 = arith.constant 0 : i32
    %c0_i32_0 = arith.constant 0 : i32
    return %arg0, %c0_i32 : i32, i32
  }
  func.func @transform_4(%arg0: i32) -> (i32, i32) {
    %c0_i32 = arith.constant 0 : i32
    %c0_i32_0 = arith.constant 0 : i32
    return %arg0, %c0_i32 : i32, i32
  }
  func.func @transform_5(%arg0: i32) -> (i32, i32) {
    %c0_i32 = arith.constant 0 : i32
    %c0_i32_0 = arith.constant 0 : i32
    return %arg0, %c0_i32 : i32, i32
  }
  func.func @transform_6(%arg0: i32) -> (i32, i32) {
    %c0_i32 = arith.constant 0 : i32
    %c0_i32_0 = arith.constant 0 : i32
    return %arg0, %c0_i32 : i32, i32
  }
}

</mosaic_0001>

<bundles_post_ra>
// kernel: tpu_custom_call.1
= control target key start
LH: loop header
LB: loop body
LE: loop exit
PB: predicated region body
PF: predicated region fallthrough
CT: control target
= control target key end

     0   :  { %s1376_s0 = inlined_call_operand.<no memory space> [shape: f32[1], index: 0, kind: input, shape index: {}]   ;;  %s1377_s1 = inlined_call_operand.hbm [shape: f32[16,38], index: 1, kind: input, shape index: {}]   ;;  %s1378_s2 = inlined_call_operand.hbm [shape: f32[38,256], index: 2, kind: input, shape index: {}]   ;;  %s1379_s3 = inlined_call_operand.vmem [shape: s8[16,256], index: 3, kind: input, shape index: {}]   ;;  %s1380_s4 = inlined_call_operand.hbm [shape: f32[16,256], index: 4, kind: input, shape index: {}]   ;;  %s1381_s5 = inlined_call_operand.hbm [shape: s32[16,256], index: 5, kind: output, shape index: {0}]   ;;  %s1382_s6 = inlined_call_operand.hbm [shape: f32[16,38], index: 6, kind: output, shape index: {1}]  }
   0x1   :  { %1390 = sst [smem:[#allocation18_spill]] %s1377_s1 }
   0x2   :  { %12 = sst [smem:[#allocation2]] %s1376_s0 }
   0x3   :  { %13 = vsyncpa [#allocation4], 0 }
   0x4   :  { %15 = vsyncpa [#allocation4 + $0x1], 0 }
   0x5   :  { %16 = vsyncpa [#allocation7], 0 }
   0x6   :  { %17 = vsyncpa [#allocation5], 0 }
   0x7   :  { %19 = vsyncpa [#allocation5 + $0x1], 0 }
   0x8   :  { %20 = vsyncpa [#allocation11], 0 }
   0x9   :  { %22 = vsyncpa [#allocation11 + $0x1], 0  ;;  %s1083_s23 = smov 0   ;;  %s1085_s24 = smov 0  }
   0xa   :  { %s1087_s25 = smov 0   ;;  %s1089_s26 = smov 0  }
   0xb LB: > { %s1104_s0 = sadd.s32 1, %s1034_s26   ;;  %s56_s27 = sadd.s32 1, %s1030_s25  ;;  %s1034_s26 = sphi %s1089_s26, %s1413_s26   ;;  %s1030_s25 = sphi %s1087_s25, %s1412_s25   ;;  %s1026_s24 = sphi %s1085_s24, %s1411_s24   ;;  %s1022_s23 = sphi %s1083_s23, %s1410_s23  }
   0xc   : > { %s53_s28 = ssub.s32 %s1034_s26, %s1104_s0  ;;  %p63_p0 = scmp.ne.s32.totalorder %s1030_s25, %s1026_s24 }
   0xd   : > { %p54_p1 = scmp.eq.s32.totalorder %s53_s28, 0  ;;  %p64_p2 = scmp.eq.s32.totalorder %s1034_s26, 0 }
   0xe   : > { %p800_p4 = scmp.lt.s32.totalorder %s1034_s26, 2  ;;  %s234_s30 = sand.u32 1, %s1034_s26  }
   0xf   : > { %s1115_s29 = scalar_select %p54_p1, %s1030_s25, %s56_s27  }
  0x10   : > { %p65_p5 = por %p64_p2, %p63_p0  ;;  %s236_s7 = sand.u32 1, %s1030_s25  }
  0x11   : > { %1391 = sst [smem:[#allocation17_spill]] %s1115_s29  ;;  %s725_s8 = sshll.u32 %s236_s7, 3 }
  0x12   : > { %s726_s9 = sshll.u32 %s1034_s26, 7  ;;  %s1392_s1 = sld [smem:[#allocation18_spill]] }
  0x13   : > { %s238_s13 = scalar_lea.vmem [#allocation3], %s725_s8  ;;  %p1128_p6 = pnand %p800_p4, %p65_p5 }
  0x14   : > { %s245_s14 = sshll.u32 %s238_s13, 4  ;;  %s1134_s16 = sshll.u32 %s236_s7, 4  ;;  %s1132_s14 = int_to_ptr.vmem [resolvable:$true] %s245_s14 }
  0x15   : > { %s1393_s15 = scalar_select %p1128_p6, 1, 0 }
  0x16   : > { %s1136_s17 = scalar_lea.sflag [#allocation4], %s234_s30  ;;  %p1384_p8 = pneg %p1128_p6 }
  0x18   : > { %s1126_s12 = scalar_lea.hbm %s1392_s1, %s726_s9  ;;  %s845_s21 = scalar_lea.hbm %s1392_s1, 256 }
  0x19   : > { %s840_s18 = scalar_lea.hbm %s1126_s12, 128  ;;  %p846_p11 = scmp.lt.u32.totalorder %s1126_s12, %s1392_s1 }
  0x1a   : > { %p841_p7 = scmp.ne.s32.totalorder %s1126_s12, %s840_s18  ;;  %p847_p12 = scmp.lt.u32.totalorder %s845_s21, %s840_s18 }
  0x1b   : > { %p849_p1 = scmp.lt.u32.totalorder %s840_s18, %s1126_s12 }
  0x1c   : > { %p843_p9 = pnand %p1384_p8, %p841_p7  ;;  %p848_p13 = por %p847_p12, %p846_p11 }
  0x1e   : > { %p844_p10 = pneg %p843_p9  ;;  %p850_p2 = por %p849_p1, %p848_p13 }
  0x20   : > { %p851_p4 = pnand %p850_p2, %p844_p10 }
  0x22   : > { %854 = shalt.err (!%p851_p4)
}
  0x23   : > { %s855_s28 = scalar_lea.vmem %s1132_s14, 128  ;;  %s1036_s30 = smov [#allocation3]  }
  0x24   : > { %p856_p5 = scmp.ne.s32.totalorder %s1132_s14, %s855_s28  ;;  %s860_s7 = sshll.u32 %s1036_s30, 4  ;;  %s861_s7 = int_to_ptr.vmem [resolvable:$false] %s860_s7 }
  0x25   : > { %s862_s8 = scalar_lea.vmem %s861_s7, 256  ;;  %p863_p3 = scmp.lt.s32.totalorder %s1132_s14, %s861_s7 }
  0x26   : > { %p858_p7 = pnand %p856_p5, %p1384_p8  ;;  %p864_p11 = scmp.lt.s32.totalorder %s862_s8, %s855_s28 }
  0x28   : > { %p859_p9 = pneg %p858_p7  ;;  %p865_p12 = por %p864_p11, %p863_p3 }
  0x2a   : > { %p866_p13 = pnand %p865_p12, %p859_p9 }
  0x2c   : > { %869 = shalt.err (!%p866_p13)
}
  0x2d   : > { %788 = dma.hbm_to_vmem [thread:$0]  (!%p1128_p6), %s1126_s12, 128, %s1132_s14, %s1136_s17  }
  0x2e   : > { %s1165_s9 = sadd.s32 4294967295, %s1034_s26   ;;  %s721_s10 = sadd.s32 4294967294, %s1034_s26  }
  0x2f   : > { %p69_p3 = scmp.ne.s32.totalorder %s1026_s24, %s1022_s23  ;;  %p1383_p10 = scmp.eq.s32.totalorder %s1165_s9, 0 }
  0x30   : > { %p166_p1 = scmp.eq.s32.totalorder %s1165_s9, 1  ;;  %p172_p2 = scmp.eq.s32.totalorder %s721_s10, 1 }
  0x31   : > { %p722_p4 = scmp.ge.s32.totalorder %s1034_s26, 1  ;;  %p1175_p5 = por %p1383_p10, %p69_p3 }
  0x32   : > { %p1182_p7 = por %p166_p1, %p63_p0  ;;  %p1186_p9 = por %p172_p2, %p69_p3 }
  0x33   : > { %s1394_s11 = scalar_select %p1175_p5, 1, 0 }
  0x34   : > { %s1395_s12 = scalar_select %p1182_p7, 1, 0 }
  0x35   : > { %s1396_s13 = scalar_select %p1186_p9, 1, 0 }
  0x36   : > { %p205_p11 = scmp.lt.s32.totalorder %s1034_s26, 3  ;;  %s1037_s18 = smov [#allocation6]  }
  0x37   : > { %s220_s19 = sshll.u32 %s1037_s18, 4  ;;  %s750_s20 = sshll.u32 %s1034_s26, 8  ;;  %s1195_s19 = int_to_ptr.vmem [resolvable:$true] %s220_s19 }
  0x38   : > { %p1191_p12 = pnand %p722_p4, %p205_p11  ;;  %s1209_s28 = scalar_lea.hbm %s1380_s4, %s750_s20 }
  0x39   : > { %s264_s30 = scalar_lea.vmem [#allocation8], %s1134_s16  ;;  %s870_s18 = scalar_lea.hbm %s1378_s2, 1280 }
  0x3a   : > { %s1397_s14 = scalar_select %p1191_p12, 1, 0 }
  0x3b   : > { %p781_p13 = pneg %p1191_p12  ;;  %s272_s7 = sshll.u32 %s264_s30, 4  ;;  %s1212_s7 = int_to_ptr.vmem [resolvable:$true] %s272_s7 }
  0x3c   : > { %p871_p3 = scmp.ne.s32.totalorder %s1378_s2, %s870_s18  ;;  %p877_p11 = scmp.lt.u32.totalorder %s870_s18, %s1378_s2 }
  0x3d   : > { %p1202_p0 = pnand %p781_p13, %p1383_p10 }
  0x3f   : > { %p872_p1 = pneg %p1202_p0 }
  0x41   : > { %p873_p2 = pnand %p872_p1, %p871_p3 }
  0x43   : > { %p874_p4 = pneg %p873_p2 }
  0x45   : > { %p879_p13 = pnand %p877_p11, %p874_p4 }
  0x47   : > { %882 = shalt.err (!%p879_p13)
}
  0x48   : > { %s883_s16 = scalar_lea.vmem %s1195_s19, 1280  ;;  %p891_p7 = scmp.lt.s32.totalorder %s1195_s19, %s1195_s19 }
  0x49   : > { %p884_p10 = scmp.ne.s32.totalorder %s1195_s19, %s883_s16  ;;  %p892_p5 = scmp.lt.s32.totalorder %s883_s16, %s883_s16 }
  0x4b   : > { %p886_p8 = pnand %p884_p10, %p872_p1  ;;  %p893_p12 = por %p892_p5, %p891_p7 }
  0x4d   : > { %p887_p9 = pneg %p886_p8 }
  0x4f   : > { %p894_p6 = pnand %p893_p12, %p887_p9 }
  0x51   : > { %897 = shalt.err (!%p894_p6)
}
  0x52   : > { %s1038_s1 = smov 256   ;;  %s1039_s29 = smov 16  }
  0x53   : > { %784 = dma.hbm_to_vmem [thread:$0]  (!%p1202_p0), %s1378_s2, 1280, %s1195_s19, [#allocation7], %s1038_s1, %s1038_s1, %s1039_s29  }
  0x54   : > { %s898_s8 = scalar_lea.hbm %s1209_s28, 256  ;;  %p1399_p10 = scmp.ne.s32.totalorder %s1393_s15, 0 }
  0x55   : > { %p899_p8 = scmp.ne.s32.totalorder %s1209_s28, %s898_s8  ;;  %s903_s22 = scalar_lea.hbm %s1380_s4, 512 }
  0x56   : > { %p1400_p5 = pneg %p1399_p10  ;;  %p904_p9 = scmp.lt.u32.totalorder %s1209_s28, %s1380_s4 }
  0x57   : > { %p905_p12 = scmp.lt.u32.totalorder %s903_s22, %s898_s8  ;;  %p907_p1 = scmp.lt.u32.totalorder %s898_s8, %s1209_s28 }
  0x58   : > { %p901_p7 = pnand %p899_p8, %p1400_p5 }
  0x59   : > { %p906_p3 = por %p905_p12, %p904_p9 }
  0x5a   : > { %p902_p6 = pneg %p901_p7 }
  0x5b   : > { %p908_p2 = por %p907_p1, %p906_p3 }
  0x5d   : > { %p909_p4 = pnand %p908_p2, %p902_p6 }
  0x5f   : > { %912 = shalt.err (!%p909_p4)
}
  0x60   : > { %s913_s19 = scalar_lea.vmem %s1212_s7, 256  ;;  %p1401_p11 = pmov %p1400_p5 }
  0x61   : > { %p914_p0 = scmp.ne.s32.totalorder %s1212_s7, %s913_s19  ;;  %s1040_s21 = smov [#allocation8]  }
  0x62   : > { %s918_s1 = sshll.u32 %s1040_s21, 4  ;;  %s919_s1 = int_to_ptr.vmem [resolvable:$false] %s918_s1 }
  0x63   : > { %p916_p13 = pnand %p914_p0, %p1401_p11  ;;  %s920_s29 = scalar_lea.vmem %s919_s1, 512 }
  0x64   : > { %p921_p5 = scmp.lt.s32.totalorder %s1212_s7, %s919_s1  ;;  %p922_p7 = scmp.lt.s32.totalorder %s920_s29, %s913_s19 }
  0x65   : > { %p917_p8 = pneg %p916_p13 }
  0x66   : > { %p923_p9 = por %p922_p7, %p921_p5 }
  0x68   : > { %p924_p12 = pnand %p923_p9, %p917_p8 }
  0x6a   : > { %927 = shalt.err (!%p924_p12)
}
  0x6b   : > { %791 = dma.hbm_to_vmem [thread:$0]  (!%p1399_p10), %s1209_s28, 256, %s1212_s7, %s1136_s17  }
  0x6c   : > { %p1402_p6 = scmp.ne.s32.totalorder %s1397_s14, 0 }
  0x6d   : > { %s283_s20 = sand.u32 (!%p1402_p6), 1, %s1165_s9   ;;  %s1263_s30 = sand.u32 (!%p1402_p6), 1, %s1026_s24  }
  0x6e   : > { %281 = sbr.rel (%p1402_p6) target bundleno = 731 (0x2db), region = 40  ;;  %s731_s8 = sshll.u32 (!%p1402_p6), %s1263_s30, 3 }
  0x6f   : > { %s284_s10 = scalar_lea.sflag (!%p1402_p6), [#allocation4], %s283_s20  ;;  %s1268_s18 = scalar_lea.vmem (!%p1402_p6), [#allocation3], %s731_s8 }
  0x70   : > { %p1403_p3 = scmp.ne.s32.totalorder (!%p1402_p6), %s1394_s11, 0 }
  0x75   : > { %1001 = dma.done.wait (%p1403_p3), %s284_s10, 128  }
  0x76   : > { %1003 = vsyncadd (%p1403_p3), %s284_s10, 4294967168  ;;  %p1404_p10 = scmp.eq.s32.totalorder %s1165_s9, 0 }
  0x78   : > { %1005 = dma.done.wait (%p1404_p10), [#allocation7], 1280   ;;  %p1405_p1 = pmov %p1404_p10 }
  0x79   : > { %s733_s15 = sshll.u32 %s1263_s30, 4 }
  0x7a   : > { %1007 = vsyncadd (%p1405_p1), [#allocation7], 4294966016  ;;  %s1281_s17 = scalar_lea.vmem [#allocation8], %s733_s15 }
  0x7b   : > { %1009 = dma.done.wait (%p1403_p3), %s284_s10, 256  }
  0x7c   : > { %1011 = vsyncadd (%p1403_p3), %s284_s10, 4294967040  ;;  %v1041_v0 = vmov 0.0   ;;  %v352_v1 = vld [vmem:[#allocation6 + $0x8] sm:$0xff]  ;;  %v354_v2 = vld [vmem:[#allocation6 + $0x18] sm:$0xff]  ;;  %vm367_vm0 = vcmask 1045504   ;;  %vm363_vm1 = vcmask 310272  }
  0x7d   : > { %438 = vmatprep.mubr.f32.mxu0 %v1041_v0  ;;  %v351_v3 = vld [vmem:[#allocation6] sm:$0xff]  ;;  %v753_v4 = vpack.c.bf16 %v354_v2, %v352_v1  ;;  %v353_v5 = vld [vmem:[#allocation6 + $0x10] sm:$0xff]  ;;  %v356_v6 = vld [vmem:[#allocation6 + $0x28] sm:$0xff]  ;;  %p344_p2 = scmp.lt.s32.totalorder %s1165_s9, 1  ;;  %s361_s27 = sld [smem:[#allocation2]]  ;;  %v1042_v22 = vmov 0  }
  0x7e   : > { %v358_v7 = vld [vmem:[#allocation6 + $0x38] sm:$0xff]  ;;  %v755_v8 = vpack.c.bf16 %v353_v5, %v351_v3  ;;  %v355_v10 = vld [vmem:[#allocation6 + $0x20] sm:$0xff]  ;;  %v357_v11 = vld [vmem:[#allocation6 + $0x30] sm:$0xff]  ;;  %s336_s16 = scalar_lea.vmem [#allocation9], %s733_s15  ;;  %s752_s19 = sshll.u32 %s1165_s9, 8 }
  0x7f   : > { %v757_v9 = vpack.c.bf16 %v358_v7, %v356_v6  ;;  %754 = vmatprep.subr.bf16.mxu0 %v753_v4  ;;  %762 = vmatprep.subr.bf16.mxu1 %v753_v4  ;;  %v759_v12 = vpack.c.bf16 %v357_v11, %v355_v10  ;;  %v360_v13 = vld [vmem:[#allocation6 + $0x48] sm:$0x3f]  ;;  %v359_v14 = vld [vmem:[#allocation6 + $0x40] sm:$0x3f]  ;;  %v362_v15 = vld [vmem:[%s1268_s18] sm:$0xff]  ;;  %s345_s11 = scalar_select %p344_p2, %s1165_s9, 1 }
  0x80   : > { %756 = vmatpush1.bf16.msra.mxu0 %v755_v8  ;;  %764 = vmatpush1.bf16.xpose.msra.mxu1 %v755_v8  ;;  %v463_v29 = vld [vmem:[%s1281_s17] sm:$0xff]  ;;  %v464_v30 = vld [vmem:[%s1281_s17 + $0x8] sm:$0xff]  ;;  %s564_s21 = sshll.u32 %s336_s16, 4  ;;  %s1305_s20 = scalar_lea.hbm %s1381_s5, %s752_s19  ;;  %s565_s21 = int_to_ptr.vmem [resolvable:$true] %s564_s21 }
  0x81   : > { %758 = vmatprep.subr.bf16.mxu0 %v757_v9  ;;  %766 = vmatprep.subr.bf16.mxu1 %v757_v9  ;;  %s751_s14 = sshll.u32 %s345_s11, 2  ;;  %s545_s10 = scalar_lea.sflag [#allocation5], %s1263_s30 }
  0x82   : > { %s348_s22 = scalar_lea.vmem %s1379_s3, %s751_s14  ;;  %s928_s18 = scalar_lea.vmem %s565_s21, 256 }
  0x83   : > { %v454_v21 = vld [vmem:[%s348_s22] sm:$0xf]  ;;  %v450_v25 = vstv %s361_s27  ;;  %p929_p4 = scmp.ne.s32.totalorder %s565_s21, %s928_s18  ;;  %p1406_p0 = scmp.ne.s32.totalorder %s1395_s12, 0 }
  0x84   : > { %760 = vmatpush1.bf16.msra.mxu0 %v759_v12  ;;  %vm455_vm2 = vnez %v454_v21  ;;  %s1043_s15 = smov [#allocation9]  }
  0x85   : > { %738 = vmatprep.subr.msk.mxu0 %vm367_vm0, %v360_v13  ;;  %v456_v23 = vsel %vm455_vm2, 16843009, %v1042_v22  ;;  %p930_p11 = pnand %p929_p4, %p1406_p0  ;;  %s932_s17 = sshll.u32 %s1043_s15, 4  ;;  %s933_s17 = int_to_ptr.vmem [resolvable:$false] %s932_s17 }
  0x86   : > { %v457_v24 = vunpack.c.0.s8 %v456_v23  ;;  %v458_v26 = vunpack.c.1.s8 %v456_v23  ;;  %s934_s11 = scalar_lea.vmem %s933_s17, 512  ;;  %p935_p8 = scmp.lt.s32.totalorder %s565_s21, %s933_s17 }
  0x87   : > { %p931_p13 = pneg %p930_p11  ;;  %p936_p5 = scmp.lt.s32.totalorder %s934_s11, %s928_s18 }
  0x88   : > { %739 = vmatpush1.msk.msra.mxu0 %vm367_vm0, %v359_v14  ;;  %768 = vmatpush1.bf16.xpose.msra.mxu1 %v759_v12  ;;  %vm459_vm3 = vcmp.ne.s32.totalorder %v457_v24, 0  ;;  %vm460_vm4 = vcmp.ne.s32.totalorder %v458_v26, 0 }
  0x89   : > { %740 = vmatmul.mubr.msk.f32.vlgmr.msra.gmra.mrb[0].mxu0 %vm363_vm1, %v362_v15  ;;  %479 = vmatprep.subr.mxu1 %v360_v13  ;;  %p937_p7 = por %p936_p5, %p935_p8 }
  0x8b   : > { %p938_p9 = pnand %p937_p7, %p931_p13 }
  0x90   : > { %480 = vmatpush1.xpose.msra.mxu1 %v359_v14 }
 0x15c   : > { %v440_v16 = vpop.f32.mrb[0].mxu0 }
 0x15d   : > { %v445_v17 = vand.u32 2147483647, %v440_v16  ;;  %v442_v18 = vpop.f32.mrb[1].mxu0 }
 0x15e   : > { %v446_v19 = vand.u32 2147483647, %v442_v18 }
 0x160   : > { %v447_v20 = vmax.f32 %v445_v17, %v446_v19 }
 0x162   : > { %448 = vmax.xlane.f32.xlu0 %v447_v20 }
 0x1ef   : > { %v449_v27 = vpop.xlane.xlu0 %448 }
 0x1f0   : > { %v451_v28 = vmul.f32 %v450_v25, %v449_v27 }
 0x1f2   : > { %vm452_vm5 = vcmp.gt.f32.partialorder %v445_v17, %v451_v28  ;;  %vm453_vm6 = vcmp.gt.f32.partialorder %v446_v19, %v451_v28 }
 0x1f3   : > { %vm461_vm7 = vmor %vm452_vm5, %vm459_vm3 }
 0x1f4   : > { %v465_v31 = vsel %vm461_vm7, 1, %v1042_v22  ;;  %v741_v32 = vsel %vm461_vm7, 1.0, %v1041_v0  ;;  %vm462_vm8 = vmor %vm453_vm6, %vm460_vm4 }
 0x1f5   : > { %541 = vst [vmem:[%s336_s16] sm:$0xff] %v465_v31  ;;  %v466_v33 = vsel %vm462_vm8, 1, %v1042_v22  ;;  %v742_v34 = vsel %vm462_vm8, 1.0, %v1041_v0  ;;  %v469_v35 = vmul.f32 %v741_v32, %v463_v29 }
 0x1f6   : > { %v470_v36 = vmul.f32 %v742_v34, %v464_v30  ;;  %542 = vst [vmem:[%s336_s16 + $0x8] sm:$0xff] %v466_v33 }
 0x1f8   : > { %535 = vmatprep.mubr.f32.mxu1 %v470_v36 }
 0x1f9   : > { %536 = vmatmul.mubr.f32.vlgmr.msra.gmra.mrb[0].mxu1 %v469_v35 }
 0x1fa   : > { %941 = shalt.err (!%p938_p9)
}
 0x1fb   : > { %s942_s14 = scalar_lea.hbm %s1305_s20, 256  ;;  %s946_s22 = scalar_lea.hbm %s1381_s5, 512 }
 0x1fc   : > { %p943_p12 = scmp.ne.s32.totalorder %s1305_s20, %s942_s14  ;;  %p947_p10 = scmp.lt.u32.totalorder %s1305_s20, %s1381_s5 }
 0x1fd   : > { %p948_p1 = scmp.lt.u32.totalorder %s946_s22, %s942_s14  ;;  %p950_p4 = scmp.lt.u32.totalorder %s942_s14, %s1305_s20 }
 0x1fe   : > { %p944_p6 = pnand %p943_p12, %p1406_p0 }
 0x1ff   : > { %p949_p2 = por %p948_p1, %p947_p10 }
 0x200   : > { %p945_p3 = pneg %p944_p6 }
 0x201   : > { %p951_p11 = por %p950_p4, %p949_p2 }
 0x203   : > { %p952_p13 = pnand %p951_p11, %p945_p3 }
 0x205   : > { %955 = shalt.err (!%p952_p13)
}
 0x206   : > { %777 = dma.vmem_to_hbm [thread:$0]  (%p1406_p0), %s565_s21, 256, %s1305_s20, %s545_s10  }
 0x207   : > { %s747_s19 = sshll.u32 %s1165_s9, 7  ;;  %s343_s1 = scalar_lea.vmem [#allocation10], %s731_s8 }
 0x208   : > { %s577_s29 = sshll.u32 %s343_s1, 4  ;;  %s1331_s17 = scalar_lea.hbm %s1382_s6, %s747_s19  ;;  %s1333_s29 = int_to_ptr.vmem [resolvable:$true] %s577_s29 }
 0x209   : > { %s550_s11 = scalar_lea.sflag [#allocation11], %s1263_s30  ;;  %s956_s21 = scalar_lea.vmem %s1333_s29, 128 }
 0x20a   : > { %p957_p8 = scmp.ne.s32.totalorder %s1333_s29, %s956_s21  ;;  %s1044_s9 = smov [#allocation10]  }
 0x20b   : > { %s960_s8 = sshll.u32 %s1044_s9, 4  ;;  %s961_s8 = int_to_ptr.vmem [resolvable:$false] %s960_s8 }
 0x20c   : > { %p958_p5 = pnand %p957_p8, %p1406_p0  ;;  %s962_s20 = scalar_lea.vmem %s961_s8, 256 }
 0x20d   : > { %p963_p9 = scmp.lt.s32.totalorder %s1333_s29, %s961_s8  ;;  %p964_p12 = scmp.lt.s32.totalorder %s962_s20, %s956_s21 }
 0x20e   : > { %p959_p7 = pneg %p958_p5 }
 0x20f   : > { %p965_p6 = por %p964_p12, %p963_p9 }
 0x211   : > { %p966_p3 = pnand %p965_p6, %p959_p7 }
 0x2cc   : > { %v537_v37 = vpop.f32.mrb[0].mxu1 }
 0x2cd   : > { %543 = vst.msk [vmem:[%s343_s1] sm:$0xff] %vm363_vm1, %v537_v37  ;;  %v539_v38 = vpop.f32.mrb[1].mxu1 }
 0x2ce   : > { %969 = shalt.err (!%p966_p3)
}
 0x2cf   : > { %s970_s30 = scalar_lea.hbm %s1331_s17, 128  ;;  %s974_s28 = scalar_lea.hbm %s1382_s6, 256 }
 0x2d0   : > { %p971_p10 = scmp.ne.s32.totalorder %s1331_s17, %s970_s30  ;;  %p975_p4 = scmp.lt.u32.totalorder %s1331_s17, %s1382_s6 }
 0x2d1   : > { %p976_p11 = scmp.lt.u32.totalorder %s974_s28, %s970_s30  ;;  %p978_p8 = scmp.lt.u32.totalorder %s970_s30, %s1331_s17 }
 0x2d2   : > { %p972_p1 = pnand %p971_p10, %p1406_p0 }
 0x2d3   : > { %p977_p13 = por %p976_p11, %p975_p4 }
 0x2d4   : > { %p973_p2 = pneg %p972_p1 }
 0x2d5   : > { %p979_p5 = por %p978_p8, %p977_p13 }
 0x2d7   : > { %p980_p7 = pnand %p979_p5, %p973_p2 }
 0x2d9   : > { %983 = shalt.err (!%p980_p7)
}
 0x2da   : > { %778 = dma.vmem_to_hbm [thread:$0]  (%p1406_p0), %s1333_s29, 128, %s1331_s17, %s550_s11  }
 0x2db PF: > { %s589_s27 = sand.u32 1, %s1022_s23   ;;  %p1407_p9 = scmp.ne.s32.totalorder %s1396_s13, 0 }
 0x2dc   : > { %p1408_p12 = scmp.ge.s32.totalorder %s1034_s26, 2  ;;  %s590_s16 = scalar_lea.sflag [#allocation5], %s589_s27 }
 0x2de   : > { %p793_p6 = pnand %p1408_p12, %p1407_p9 }
 0x2e0   : > { %1013 = dma.done.wait (!%p793_p6), %s590_s16, 256  }
 0x2e1   : > { %1015 = vsyncadd (!%p793_p6), %s590_s16, 4294967040  ;;  %s599_s19 = scalar_lea.sflag [#allocation11], %s589_s27 }
 0x2e2   : > { %1017 = dma.done.wait (!%p793_p6), %s599_s19, 128  }
 0x2e3   : > { %1019 = vsyncadd (!%p793_p6), %s599_s19, 4294967168  ;;  %s1409_s12 = sld [smem:[#allocation17_spill]]  ;;  %p25_p0 = scmp.ge.s32.totalorder %s1104_s0, 4  }
 0x2e4   : > { %s1410_s23 = smov %s1026_s24  ;;  %s1411_s24 = smov %s1030_s25 }
 0x2e5   : > { %s1413_s26 = smov %s1104_s0  ;;  %27 = sbr.rel (!%p25_p0) target bundleno = 11 (0xb), region = 120 }
 0x2e9   : > { %s1412_s25 = smov %s1409_s12 }
 0x2ec   :  { %604 = vsyncpa [#allocation4], 1 }
 0x2ed   :  { %606 = vsyncpa [#allocation4 + $0x1], 1 }
 0x2ee   :  { %607 = vsyncpa [#allocation7], 1 }
 0x2ef   :  { %608 = vsyncpa [#allocation5], 1 }
 0x2f0   :  { %610 = vsyncpa [#allocation5 + $0x1], 1 }
 0x2f1   :  { %611 = vsyncpa [#allocation11], 1 }
 0x2f2   :  { %613 = vsyncpa [#allocation11 + $0x1], 1 }

// kernel: tpu_custom_call.1
= control target key start
LH: loop header
LB: loop body
LE: loop exit
PB: predicated region body
PF: predicated region fallthrough
CT: control target
= control target key end

     0   :  { %s1376_s0 = inlined_call_operand.<no memory space> [shape: f32[1], index: 0, kind: input, shape index: {}]   ;;  %s1377_s1 = inlined_call_operand.hbm [shape: f32[16,38], index: 1, kind: input, shape index: {}]   ;;  %s1378_s2 = inlined_call_operand.hbm [shape: f32[38,256], index: 2, kind: input, shape index: {}]   ;;  %s1379_s3 = inlined_call_operand.vmem [shape: s8[16,256], index: 3, kind: input, shape index: {}]   ;;  %s1380_s4 = inlined_call_operand.hbm [shape: f32[16,256], index: 4, kind: input, shape index: {}]   ;;  %s1381_s5 = inlined_call_operand.hbm [shape: s32[16,256], index: 5, kind: output, shape index: {0}]   ;;  %s1382_s6 = inlined_call_operand.hbm [shape: f32[16,38], index: 6, kind: output, shape index: {1}]  }
   0x1   :  { %1390 = sst [smem:[#allocation18_spill]] %s1377_s1 }
   0x2   :  { %12 = sst [smem:[#allocation2]] %s1376_s0 }
   0x3   :  { %13 = vsyncpa [#allocation4], 0 }
   0x4   :  { %15 = vsyncpa [#allocation4 + $0x1], 0 }
   0x5   :  { %16 = vsyncpa [#allocation7], 0 }
   0x6   :  { %17 = vsyncpa [#allocation5], 0 }
   0x7   :  { %19 = vsyncpa [#allocation5 + $0x1], 0 }
   0x8   :  { %20 = vsyncpa [#allocation11], 0 }
   0x9   :  { %22 = vsyncpa [#allocation11 + $0x1], 0  ;;  %s1083_s23 = smov 0   ;;  %s1085_s24 = smov 0  }
   0xa   :  { %s1087_s25 = smov 0   ;;  %s1089_s26 = smov 0  }
   0xb LB: > { %s1104_s0 = sadd.s32 1, %s1034_s26   ;;  %s56_s27 = sadd.s32 1, %s1030_s25  ;;  %s1034_s26 = sphi %s1089_s26, %s1413_s26   ;;  %s1030_s25 = sphi %s1087_s25, %s1412_s25   ;;  %s1026_s24 = sphi %s1085_s24, %s1411_s24   ;;  %s1022_s23 = sphi %s1083_s23, %s1410_s23  }
   0xc   : > { %s53_s28 = ssub.s32 %s1034_s26, %s1104_s0  ;;  %p63_p0 = scmp.ne.s32.totalorder %s1030_s25, %s1026_s24 }
   0xd   : > { %p54_p1 = scmp.eq.s32.totalorder %s53_s28, 0  ;;  %p64_p2 = scmp.eq.s32.totalorder %s1034_s26, 0 }
   0xe   : > { %p800_p4 = scmp.lt.s32.totalorder %s1034_s26, 2  ;;  %s234_s30 = sand.u32 1, %s1034_s26  }
   0xf   : > { %s1115_s29 = scalar_select %p54_p1, %s1030_s25, %s56_s27  }
  0x10   : > { %p65_p5 = por %p64_p2, %p63_p0  ;;  %s236_s7 = sand.u32 1, %s1030_s25  }
  0x11   : > { %1391 = sst [smem:[#allocation17_spill]] %s1115_s29  ;;  %s725_s8 = sshll.u32 %s236_s7, 3 }
  0x12   : > { %s726_s9 = sshll.u32 %s1034_s26, 7  ;;  %s1392_s1 = sld [smem:[#allocation18_spill]] }
  0x13   : > { %s238_s13 = scalar_lea.vmem [#allocation3], %s725_s8  ;;  %p1128_p6 = pnand %p800_p4, %p65_p5 }
  0x14   : > { %s245_s14 = sshll.u32 %s238_s13, 4  ;;  %s1134_s16 = sshll.u32 %s236_s7, 4  ;;  %s1132_s14 = int_to_ptr.vmem [resolvable:$true] %s245_s14 }
  0x15   : > { %s1393_s15 = scalar_select %p1128_p6, 1, 0 }
  0x16   : > { %s1136_s17 = scalar_lea.sflag [#allocation4], %s234_s30  ;;  %p1384_p8 = pneg %p1128_p6 }
  0x18   : > { %s1126_s12 = scalar_lea.hbm %s1392_s1, %s726_s9  ;;  %s845_s21 = scalar_lea.hbm %s1392_s1, 256 }
  0x19   : > { %s840_s18 = scalar_lea.hbm %s1126_s12, 128  ;;  %p846_p11 = scmp.lt.u32.totalorder %s1126_s12, %s1392_s1 }
  0x1a   : > { %p841_p7 = scmp.ne.s32.totalorder %s1126_s12, %s840_s18  ;;  %p847_p12 = scmp.lt.u32.totalorder %s845_s21, %s840_s18 }
  0x1b   : > { %p849_p1 = scmp.lt.u32.totalorder %s840_s18, %s1126_s12 }
  0x1c   : > { %p843_p9 = pnand %p1384_p8, %p841_p7  ;;  %p848_p13 = por %p847_p12, %p846_p11 }
  0x1e   : > { %p844_p10 = pneg %p843_p9  ;;  %p850_p2 = por %p849_p1, %p848_p13 }
  0x20   : > { %p851_p4 = pnand %p850_p2, %p844_p10 }
  0x22   : > { %854 = shalt.err (!%p851_p4)
}
  0x23   : > { %s855_s28 = scalar_lea.vmem %s1132_s14, 128  ;;  %s1036_s30 = smov [#allocation3]  }
  0x24   : > { %p856_p5 = scmp.ne.s32.totalorder %s1132_s14, %s855_s28  ;;  %s860_s7 = sshll.u32 %s1036_s30, 4  ;;  %s861_s7 = int_to_ptr.vmem [resolvable:$false] %s860_s7 }
  0x25   : > { %s862_s8 = scalar_lea.vmem %s861_s7, 256  ;;  %p863_p3 = scmp.lt.s32.totalorder %s1132_s14, %s861_s7 }
  0x26   : > { %p858_p7 = pnand %p856_p5, %p1384_p8  ;;  %p864_p11 = scmp.lt.s32.totalorder %s862_s8, %s855_s28 }
  0x28   : > { %p859_p9 = pneg %p858_p7  ;;  %p865_p12 = por %p864_p11, %p863_p3 }
  0x2a   : > { %p866_p13 = pnand %p865_p12, %p859_p9 }
  0x2c   : > { %869 = shalt.err (!%p866_p13)
}
  0x2d   : > { %788 = dma.hbm_to_vmem [thread:$0]  (!%p1128_p6), %s1126_s12, 128, %s1132_s14, %s1136_s17  }
  0x2e   : > { %s1165_s9 = sadd.s32 4294967295, %s1034_s26   ;;  %s721_s10 = sadd.s32 4294967294, %s1034_s26  }
  0x2f   : > { %p69_p3 = scmp.ne.s32.totalorder %s1026_s24, %s1022_s23  ;;  %p1383_p10 = scmp.eq.s32.totalorder %s1165_s9, 0 }
  0x30   : > { %p166_p1 = scmp.eq.s32.totalorder %s1165_s9, 1  ;;  %p172_p2 = scmp.eq.s32.totalorder %s721_s10, 1 }
  0x31   : > { %p722_p4 = scmp.ge.s32.totalorder %s1034_s26, 1  ;;  %p1175_p5 = por %p1383_p10, %p69_p3 }
  0x32   : > { %p1182_p7 = por %p166_p1, %p63_p0  ;;  %p1186_p9 = por %p172_p2, %p69_p3 }
  0x33   : > { %s1394_s11 = scalar_select %p1175_p5, 1, 0 }
  0x34   : > { %s1395_s12 = scalar_select %p1182_p7, 1, 0 }
  0x35   : > { %s1396_s13 = scalar_select %p1186_p9, 1, 0 }
  0x36   : > { %p205_p11 = scmp.lt.s32.totalorder %s1034_s26, 3  ;;  %s1037_s18 = smov [#allocation6]  }
  0x37   : > { %s220_s19 = sshll.u32 %s1037_s18, 4  ;;  %s750_s20 = sshll.u32 %s1034_s26, 8  ;;  %s1195_s19 = int_to_ptr.vmem [resolvable:$true] %s220_s19 }
  0x38   : > { %p1191_p12 = pnand %p722_p4, %p205_p11  ;;  %s1209_s28 = scalar_lea.hbm %s1380_s4, %s750_s20 }
  0x39   : > { %s264_s30 = scalar_lea.vmem [#allocation8], %s1134_s16  ;;  %s870_s18 = scalar_lea.hbm %s1378_s2, 1280 }
  0x3a   : > { %s1397_s14 = scalar_select %p1191_p12, 1, 0 }
  0x3b   : > { %p781_p13 = pneg %p1191_p12  ;;  %s272_s7 = sshll.u32 %s264_s30, 4  ;;  %s1212_s7 = int_to_ptr.vmem [resolvable:$true] %s272_s7 }
  0x3c   : > { %p871_p3 = scmp.ne.s32.totalorder %s1378_s2, %s870_s18  ;;  %p877_p11 = scmp.lt.u32.totalorder %s870_s18, %s1378_s2 }
  0x3d   : > { %p1202_p0 = pnand %p781_p13, %p1383_p10 }
  0x3f   : > { %p872_p1 = pneg %p1202_p0 }
  0x41   : > { %p873_p2 = pnand %p872_p1, %p871_p3 }
  0x43   : > { %p874_p4 = pneg %p873_p2 }
  0x45   : > { %p879_p13 = pnand %p877_p11, %p874_p4 }
  0x47   : > { %882 = shalt.err (!%p879_p13)
}
  0x48   : > { %s883_s16 = scalar_lea.vmem %s1195_s19, 1280  ;;  %p891_p7 = scmp.lt.s32.totalorder %s1195_s19, %s1195_s19 }
  0x49   : > { %p884_p10 = scmp.ne.s32.totalorder %s1195_s19, %s883_s16  ;;  %p892_p5 = scmp.lt.s32.totalorder %s883_s16, %s883_s16 }
  0x4b   : > { %p886_p8 = pnand %p884_p10, %p872_p1  ;;  %p893_p12 = por %p892_p5, %p891_p7 }
  0x4d   : > { %p887_p9 = pneg %p886_p8 }
  0x4f   : > { %p894_p6 = pnand %p893_p12, %p887_p9 }
  0x51   : > { %897 = shalt.err (!%p894_p6)
}
  0x52   : > { %s1038_s1 = smov 256   ;;  %s1039_s29 = smov 16  }
  0x53   : > { %784 = dma.hbm_to_vmem [thread:$0]  (!%p1202_p0), %s1378_s2, 1280, %s1195_s19, [#allocation7], %s1038_s1, %s1038_s1, %s1039_s29  }
  0x54   : > { %s898_s8 = scalar_lea.hbm %s1209_s28, 256  ;;  %p1399_p10 = scmp.ne.s32.totalorder %s1393_s15, 0 }
  0x55   : > { %p899_p8 = scmp.ne.s32.totalorder %s1209_s28, %s898_s8  ;;  %s903_s22 = scalar_lea.hbm %s1380_s4, 512 }
  0x56   : > { %p1400_p5 = pneg %p1399_p10  ;;  %p904_p9 = scmp.lt.u32.totalorder %s1209_s28, %s1380_s4 }
  0x57   : > { %p905_p12 = scmp.lt.u32.totalorder %s903_s22, %s898_s8  ;;  %p907_p1 = scmp.lt.u32.totalorder %s898_s8, %s1209_s28 }
  0x58   : > { %p901_p7 = pnand %p899_p8, %p1400_p5 }
  0x59   : > { %p906_p3 = por %p905_p12, %p904_p9 }
  0x5a   : > { %p902_p6 = pneg %p901_p7 }
  0x5b   : > { %p908_p2 = por %p907_p1, %p906_p3 }
  0x5d   : > { %p909_p4 = pnand %p908_p2, %p902_p6 }
  0x5f   : > { %912 = shalt.err (!%p909_p4)
}
  0x60   : > { %s913_s19 = scalar_lea.vmem %s1212_s7, 256  ;;  %p1401_p11 = pmov %p1400_p5 }
  0x61   : > { %p914_p0 = scmp.ne.s32.totalorder %s1212_s7, %s913_s19  ;;  %s1040_s21 = smov [#allocation8]  }
  0x62   : > { %s918_s1 = sshll.u32 %s1040_s21, 4  ;;  %s919_s1 = int_to_ptr.vmem [resolvable:$false] %s918_s1 }
  0x63   : > { %p916_p13 = pnand %p914_p0, %p1401_p11  ;;  %s920_s29 = scalar_lea.vmem %s919_s1, 512 }
  0x64   : > { %p921_p5 = scmp.lt.s32.totalorder %s1212_s7, %s919_s1  ;;  %p922_p7 = scmp.lt.s32.totalorder %s920_s29, %s913_s19 }
  0x65   : > { %p917_p8 = pneg %p916_p13 }
  0x66   : > { %p923_p9 = por %p922_p7, %p921_p5 }
  0x68   : > { %p924_p12 = pnand %p923_p9, %p917_p8 }
  0x6a   : > { %927 = shalt.err (!%p924_p12)
}
  0x6b   : > { %791 = dma.hbm_to_vmem [thread:$0]  (!%p1399_p10), %s1209_s28, 256, %s1212_s7, %s1136_s17  }
  0x6c   : > { %p1402_p6 = scmp.ne.s32.totalorder %s1397_s14, 0 }
  0x6d   : > { %s283_s20 = sand.u32 (!%p1402_p6), 1, %s1165_s9   ;;  %s1263_s30 = sand.u32 (!%p1402_p6), 1, %s1026_s24  }
  0x6e   : > { %281 = sbr.rel (%p1402_p6) target bundleno = 731 (0x2db), region = 40  ;;  %s731_s8 = sshll.u32 (!%p1402_p6), %s1263_s30, 3 }
  0x6f   : > { %s284_s10 = scalar_lea.sflag (!%p1402_p6), [#allocation4], %s283_s20  ;;  %s1268_s18 = scalar_lea.vmem (!%p1402_p6), [#allocation3], %s731_s8 }
  0x70   : > { %p1403_p3 = scmp.ne.s32.totalorder (!%p1402_p6), %s1394_s11, 0 }
  0x75   : > { %1001 = dma.done.wait (%p1403_p3), %s284_s10, 128  }
  0x76   : > { %1003 = vsyncadd (%p1403_p3), %s284_s10, 4294967168  ;;  %p1404_p10 = scmp.eq.s32.totalorder %s1165_s9, 0 }
  0x78   : > { %1005 = dma.done.wait (%p1404_p10), [#allocation7], 1280   ;;  %p1405_p1 = pmov %p1404_p10 }
  0x79   : > { %s733_s15 = sshll.u32 %s1263_s30, 4 }
  0x7a   : > { %1007 = vsyncadd (%p1405_p1), [#allocation7], 4294966016  ;;  %s1281_s17 = scalar_lea.vmem [#allocation8], %s733_s15 }
  0x7b   : > { %1009 = dma.done.wait (%p1403_p3), %s284_s10, 256  }
  0x7c   : > { %1011 = vsyncadd (%p1403_p3), %s284_s10, 4294967040  ;;  %v1041_v0 = vmov 0.0   ;;  %v352_v1 = vld [vmem:[#allocation6 + $0x8] sm:$0xff]  ;;  %v354_v2 = vld [vmem:[#allocation6 + $0x18] sm:$0xff]  ;;  %vm367_vm0 = vcmask 1045504   ;;  %vm363_vm1 = vcmask 310272  }
  0x7d   : > { %438 = vmatprep.mubr.f32.mxu0 %v1041_v0  ;;  %v351_v3 = vld [vmem:[#allocation6] sm:$0xff]  ;;  %v753_v4 = vpack.c.bf16 %v354_v2, %v352_v1  ;;  %v353_v5 = vld [vmem:[#allocation6 + $0x10] sm:$0xff]  ;;  %v356_v6 = vld [vmem:[#allocation6 + $0x28] sm:$0xff]  ;;  %p344_p2 = scmp.lt.s32.totalorder %s1165_s9, 1  ;;  %s361_s27 = sld [smem:[#allocation2]]  ;;  %v1042_v22 = vmov 0  }
  0x7e   : > { %v358_v7 = vld [vmem:[#allocation6 + $0x38] sm:$0xff]  ;;  %v755_v8 = vpack.c.bf16 %v353_v5, %v351_v3  ;;  %v355_v10 = vld [vmem:[#allocation6 + $0x20] sm:$0xff]  ;;  %v357_v11 = vld [vmem:[#allocation6 + $0x30] sm:$0xff]  ;;  %s336_s16 = scalar_lea.vmem [#allocation9], %s733_s15  ;;  %s752_s19 = sshll.u32 %s1165_s9, 8 }
  0x7f   : > { %v757_v9 = vpack.c.bf16 %v358_v7, %v356_v6  ;;  %754 = vmatprep.subr.bf16.mxu0 %v753_v4  ;;  %762 = vmatprep.subr.bf16.mxu1 %v753_v4  ;;  %v759_v12 = vpack.c.bf16 %v357_v11, %v355_v10  ;;  %v360_v13 = vld [vmem:[#allocation6 + $0x48] sm:$0x3f]  ;;  %v359_v14 = vld [vmem:[#allocation6 + $0x40] sm:$0x3f]  ;;  %v362_v15 = vld [vmem:[%s1268_s18] sm:$0xff]  ;;  %s345_s11 = scalar_select %p344_p2, %s1165_s9, 1 }
  0x80   : > { %756 = vmatpush1.bf16.msra.mxu0 %v755_v8  ;;  %764 = vmatpush1.bf16.xpose.msra.mxu1 %v755_v8  ;;  %v463_v29 = vld [vmem:[%s1281_s17] sm:$0xff]  ;;  %v464_v30 = vld [vmem:[%s1281_s17 + $0x8] sm:$0xff]  ;;  %s564_s21 = sshll.u32 %s336_s16, 4  ;;  %s1305_s20 = scalar_lea.hbm %s1381_s5, %s752_s19  ;;  %s565_s21 = int_to_ptr.vmem [resolvable:$true] %s564_s21 }
  0x81   : > { %758 = vmatprep.subr.bf16.mxu0 %v757_v9  ;;  %766 = vmatprep.subr.bf16.mxu1 %v757_v9  ;;  %s751_s14 = sshll.u32 %s345_s11, 2  ;;  %s545_s10 = scalar_lea.sflag [#allocation5], %s1263_s30 }
  0x82   : > { %s348_s22 = scalar_lea.vmem %s1379_s3, %s751_s14  ;;  %s928_s18 = scalar_lea.vmem %s565_s21, 256 }
  0x83   : > { %v454_v21 = vld [vmem:[%s348_s22] sm:$0xf]  ;;  %v450_v25 = vstv %s361_s27  ;;  %p929_p4 = scmp.ne.s32.totalorder %s565_s21, %s928_s18  ;;  %p1406_p0 = scmp.ne.s32.totalorder %s1395_s12, 0 }
  0x84   : > { %760 = vmatpush1.bf16.msra.mxu0 %v759_v12  ;;  %vm455_vm2 = vnez %v454_v21  ;;  %s1043_s15 = smov [#allocation9]  }
  0x85   : > { %738 = vmatprep.subr.msk.mxu0 %vm367_vm0, %v360_v13  ;;  %v456_v23 = vsel %vm455_vm2, 16843009, %v1042_v22  ;;  %p930_p11 = pnand %p929_p4, %p1406_p0  ;;  %s932_s17 = sshll.u32 %s1043_s15, 4  ;;  %s933_s17 = int_to_ptr.vmem [resolvable:$false] %s932_s17 }
  0x86   : > { %v457_v24 = vunpack.c.0.s8 %v456_v23  ;;  %v458_v26 = vunpack.c.1.s8 %v456_v23  ;;  %s934_s11 = scalar_lea.vmem %s933_s17, 512  ;;  %p935_p8 = scmp.lt.s32.totalorder %s565_s21, %s933_s17 }
  0x87   : > { %p931_p13 = pneg %p930_p11  ;;  %p936_p5 = scmp.lt.s32.totalorder %s934_s11, %s928_s18 }
  0x88   : > { %739 = vmatpush1.msk.msra.mxu0 %vm367_vm0, %v359_v14  ;;  %768 = vmatpush1.bf16.xpose.msra.mxu1 %v759_v12  ;;  %vm459_vm3 = vcmp.ne.s32.totalorder %v457_v24, 0  ;;  %vm460_vm4 = vcmp.ne.s32.totalorder %v458_v26, 0 }
  0x89   : > { %740 = vmatmul.mubr.msk.f32.vlgmr.msra.gmra.mrb[0].mxu0 %vm363_vm1, %v362_v15  ;;  %479 = vmatprep.subr.mxu1 %v360_v13  ;;  %p937_p7 = por %p936_p5, %p935_p8 }
  0x8b   : > { %p938_p9 = pnand %p937_p7, %p931_p13 }
  0x90   : > { %480 = vmatpush1.xpose.msra.mxu1 %v359_v14 }
 0x15c   : > { %v440_v16 = vpop.f32.mrb[0].mxu0 }
 0x15d   : > { %v445_v17 = vand.u32 2147483647, %v440_v16  ;;  %v442_v18 = vpop.f32.mrb[1].mxu0 }
 0x15e   : > { %v446_v19 = vand.u32 2147483647, %v442_v18 }
 0x160   : > { %v447_v20 = vmax.f32 %v445_v17, %v446_v19 }
 0x162   : > { %448 = vmax.xlane.f32.xlu0 %v447_v20 }
 0x1ef   : > { %v449_v27 = vpop.xlane.xlu0 %448 }
 0x1f0   : > { %v451_v28 = vmul.f32 %v450_v25, %v449_v27 }
 0x1f2   : > { %vm452_vm5 = vcmp.gt.f32.partialorder %v445_v17, %v451_v28  ;;  %vm453_vm6 = vcmp.gt.f32.partialorder %v446_v19, %v451_v28 }
 0x1f3   : > { %vm461_vm7 = vmor %vm452_vm5, %vm459_vm3 }
 0x1f4   : > { %v465_v31 = vsel %vm461_vm7, 1, %v1042_v22  ;;  %v741_v32 = vsel %vm461_vm7, 1.0, %v1041_v0  ;;  %vm462_vm8 = vmor %vm453_vm6, %vm460_vm4 }
 0x1f5   : > { %541 = vst [vmem:[%s336_s16] sm:$0xff] %v465_v31  ;;  %v466_v33 = vsel %vm462_vm8, 1, %v1042_v22  ;;  %v742_v34 = vsel %vm462_vm8, 1.0, %v1041_v0  ;;  %v469_v35 = vmul.f32 %v741_v32, %v463_v29 }
 0x1f6   : > { %v470_v36 = vmul.f32 %v742_v34, %v464_v30  ;;  %542 = vst [vmem:[%s336_s16 + $0x8] sm:$0xff] %v466_v33 }
 0x1f8   : > { %535 = vmatprep.mubr.f32.mxu1 %v470_v36 }
 0x1f9   : > { %536 = vmatmul.mubr.f32.vlgmr.msra.gmra.mrb[0].mxu1 %v469_v35 }
 0x1fa   : > { %941 = shalt.err (!%p938_p9)
}
 0x1fb   : > { %s942_s14 = scalar_lea.hbm %s1305_s20, 256  ;;  %s946_s22 = scalar_lea.hbm %s1381_s5, 512 }
 0x1fc   : > { %p943_p12 = scmp.ne.s32.totalorder %s1305_s20, %s942_s14  ;;  %p947_p10 = scmp.lt.u32.totalorder %s1305_s20, %s1381_s5 }
 0x1fd   : > { %p948_p1 = scmp.lt.u32.totalorder %s946_s22, %s942_s14  ;;  %p950_p4 = scmp.lt.u32.totalorder %s942_s14, %s1305_s20 }
 0x1fe   : > { %p944_p6 = pnand %p943_p12, %p1406_p0 }
 0x1ff   : > { %p949_p2 = por %p948_p1, %p947_p10 }
 0x200   : > { %p945_p3 = pneg %p944_p6 }
 0x201   : > { %p951_p11 = por %p950_p4, %p949_p2 }
 0x203   : > { %p952_p13 = pnand %p951_p11, %p945_p3 }
 0x205   : > { %955 = shalt.err (!%p952_p13)
}
 0x206   : > { %777 = dma.vmem_to_hbm [thread:$0]  (%p1406_p0), %s565_s21, 256, %s1305_s20, %s545_s10  }
 0x207   : > { %s747_s19 = sshll.u32 %s1165_s9, 7  ;;  %s343_s1 = scalar_lea.vmem [#allocation10], %s731_s8 }
 0x208   : > { %s577_s29 = sshll.u32 %s343_s1, 4  ;;  %s1331_s17 = scalar_lea.hbm %s1382_s6, %s747_s19  ;;  %s1333_s29 = int_to_ptr.vmem [resolvable:$true] %s577_s29 }
 0x209   : > { %s550_s11 = scalar_lea.sflag [#allocation11], %s1263_s30  ;;  %s956_s21 = scalar_lea.vmem %s1333_s29, 128 }
 0x20a   : > { %p957_p8 = scmp.ne.s32.totalorder %s1333_s29, %s956_s21  ;;  %s1044_s9 = smov [#allocation10]  }
 0x20b   : > { %s960_s8 = sshll.u32 %s1044_s9, 4  ;;  %s961_s8 = int_to_ptr.vmem [resolvable:$false] %s960_s8 }
 0x20c   : > { %p958_p5 = pnand %p957_p8, %p1406_p0  ;;  %s962_s20 = scalar_lea.vmem %s961_s8, 256 }
 0x20d   : > { %p963_p9 = scmp.lt.s32.totalorder %s1333_s29, %s961_s8  ;;  %p964_p12 = scmp.lt.s32.totalorder %s962_s20, %s956_s21 }
 0x20e   : > { %p959_p7 = pneg %p958_p5 }
 0x20f   : > { %p965_p6 = por %p964_p12, %p963_p9 }
 0x211   : > { %p966_p3 = pnand %p965_p6, %p959_p7 }
 0x2cc   : > { %v537_v37 = vpop.f32.mrb[0].mxu1 }
 0x2cd   : > { %543 = vst.msk [vmem:[%s343_s1] sm:$0xff] %vm363_vm1, %v537_v37  ;;  %v539_v38 = vpop.f32.mrb[1].mxu1 }
 0x2ce   : > { %969 = shalt.err (!%p966_p3)
}
 0x2cf   : > { %s970_s30 = scalar_lea.hbm %s1331_s17, 128  ;;  %s974_s28 = scalar_lea.hbm %s1382_s6, 256 }
 0x2d0   : > { %p971_p10 = scmp.ne.s32.totalorder %s1331_s17, %s970_s30  ;;  %p975_p4 = scmp.lt.u32.totalorder %s1331_s17, %s1382_s6 }
 0x2d1   : > { %p976_p11 = scmp.lt.u32.totalorder %s974_s28, %s970_s30  ;;  %p978_p8 = scmp.lt.u32.totalorder %s970_s30, %s1331_s17 }
 0x2d2   : > { %p972_p1 = pnand %p971_p10, %p1406_p0 }
 0x2d3   : > { %p977_p13 = por %p976_p11, %p975_p4 }
 0x2d4   : > { %p973_p2 = pneg %p972_p1 }
 0x2d5   : > { %p979_p5 = por %p978_p8, %p977_p13 }
 0x2d7   : > { %p980_p7 = pnand %p979_p5, %p973_p2 }
 0x2d9   : > { %983 = shalt.err (!%p980_p7)
}
 0x2da   : > { %778 = dma.vmem_to_hbm [thread:$0]  (%p1406_p0), %s1333_s29, 128, %s1331_s17, %s550_s11  }
 0x2db PF: > { %s589_s27 = sand.u32 1, %s1022_s23   ;;  %p1407_p9 = scmp.ne.s32.totalorder %s1396_s13, 0 }
 0x2dc   : > { %p1408_p12 = scmp.ge.s32.totalorder %s1034_s26, 2  ;;  %s590_s16 = scalar_lea.sflag [#allocation5], %s589_s27 }
 0x2de   : > { %p793_p6 = pnand %p1408_p12, %p1407_p9 }
 0x2e0   : > { %1013 = dma.done.wait (!%p793_p6), %s590_s16, 256  }
 0x2e1   : > { %1015 = vsyncadd (!%p793_p6), %s590_s16, 4294967040  ;;  %s599_s19 = scalar_lea.sflag [#allocation11], %s589_s27 }
 0x2e2   : > { %1017 = dma.done.wait (!%p793_p6), %s599_s19, 128  }
 0x2e3   : > { %1019 = vsyncadd (!%p793_p6), %s599_s19, 4294967168  ;;  %s1409_s12 = sld [smem:[#allocation17_spill]]  ;;  %p25_p0 = scmp.ge.s32.totalorder %s1104_s0, 4  }
 0x2e4   : > { %s1410_s23 = smov %s1026_s24  ;;  %s1411_s24 = smov %s1030_s25 }
 0x2e5   : > { %s1413_s26 = smov %s1104_s0  ;;  %27 = sbr.rel (!%p25_p0) target bundleno = 11 (0xb), region = 120 }
 0x2e9   : > { %s1412_s25 = smov %s1409_s12 }
 0x2ec   :  { %604 = vsyncpa [#allocation4], 1 }
 0x2ed   :  { %606 = vsyncpa [#allocation4 + $0x1], 1 }
 0x2ee   :  { %607 = vsyncpa [#allocation7], 1 }
 0x2ef   :  { %608 = vsyncpa [#allocation5], 1 }
 0x2f0   :  { %610 = vsyncpa [#allocation5 + $0x1], 1 }
 0x2f1   :  { %611 = vsyncpa [#allocation11], 1 }
 0x2f2   :  { %613 = vsyncpa [#allocation11 + $0x1], 1 }

</bundles_post_ra>
